<compile_context>
chip_gen: v7x
topology: tpu7x:2x2x1
jax: 0.10.0
libtpu: 0.0.40
codegen_flags: <defaults>
</compile_context>

<pallas_src>
import jax
import jax.numpy as jnp
from jax.experimental import pallas as pl
from jax.experimental.pallas import tpu as pltpu

LANE = 128  # TPU lane width; logits are zero-padded to this for lane-dense stores


# ---------------------------------------------------------------------------
# Fused kernel: conv3x3 (as im2col matmul) + bias + ReLU + GAP + collapsed
# classifier, one batch chunk per grid step.
# ---------------------------------------------------------------------------
def _fused_forward_kernel(x_ref, w_ref, b_ref, pool_ref, weff_ref, beff_ref, o_ref):
    # x_ref    : (1, B*HW, K)   bf16  im2col patches for this batch chunk
    # w_ref    : (K, Cmid)      bf16  conv weights flattened as (dh, dw, cin)
    # b_ref    : (1, Cmid)      f32   conv bias
    # pool_ref : (B, B*HW)      f32   block-diagonal 1/HW averaging matrix
    # weff_ref : (Cmid, LANE)   f32   collapsed classifier weight (zero-padded)
    # beff_ref : (1, LANE)      f32   collapsed classifier bias   (zero-padded)
    # o_ref    : (1, B, LANE)   f32   padded logits for this chunk
    patches = x_ref[0]                                                    # (B*HW, K)
    h = jnp.dot(patches, w_ref[...], preferred_element_type=jnp.float32)  # MXU, bf16 in / f32 acc
    h = jnp.maximum(h + b_ref[...], 0.0)                                  # bias + ReLU (f32, VPU)
    pooled = jnp.dot(pool_ref[...], h, preferred_element_type=jnp.float32)  # (B, Cmid) GAP
    logits = jnp.dot(pooled, weff_ref[...], preferred_element_type=jnp.float32)
    logits = logits + beff_ref[...]                                       # (B, LANE)
    o_ref[0] = logits


def custom_resnet_forward(x_nchw, params):
    """x_nchw: (N, Cin, H, W) float32 (PyTorch layout) -> logits (N, 2) float32."""
    N, Cin, H, W = x_nchw.shape
    Cmid = params["w_conv"].shape[-1]
    num_classes = params["w2"].shape[-1]
    HW = H * W
    K = 9 * Cin

    # NCHW -> NHWC, im2col for conv3x3 / stride 1 / pad 1 -> (N, HW, 9*Cin)
    x_nhwc = jnp.transpose(x_nchw, (0, 2, 3, 1)).astype(jnp.float32)
    xp = jnp.pad(x_nhwc, ((0, 0), (1, 1), (1, 1), (0, 0)))
    cols = [xp[:, dh:dh + H, dw:dw + W, :] for dh in range(3) for dw in range(3)]
    patches = jnp.concatenate(cols, axis=-1).reshape(N, HW, K)

    # bf16 MXU operands (f32 accumulation happens inside the kernel)
    patches = patches.astype(jnp.bfloat16)
    w2d = params["w_conv"].reshape(K, Cmid).astype(jnp.bfloat16)
    b2d = params["b_conv"].reshape(1, Cmid).astype(jnp.float32)

    # Collapse Sequential(Linear(Cmid,1000), Linear(1000,2)): no nonlinearity
    # in between, so fold into one (Cmid, 2) affine map, padded to 128 lanes.
    w_eff = params["w1"] @ params["w2"]                          # (Cmid, nc)
    b_eff = params["b1"] @ params["w2"] + params["b2"]           # (nc,)
    w_eff_pad = jnp.zeros((Cmid, LANE), jnp.float32).at[:, :num_classes].set(w_eff)
    b_eff_pad = jnp.zeros((1, LANE), jnp.float32).at[:, :num_classes].set(b_eff)

    # Grid: 2 parallel batch chunks when the batch splits evenly (keeps both
    # v7x TensorCores busy), otherwise one chunk covering the whole batch.
    G = 2 if (N >= 2 and N % 2 == 0) else 1
    B = N // G
    patches = patches.reshape(G, B * HW, K)

    # Block-diagonal averaging matrix: row i pools rows [i*HW, (i+1)*HW).
    pool = jnp.repeat(jnp.eye(B, dtype=jnp.float32), HW, axis=1) / float(HW)  # (B, B*HW)

    out = pl.pallas_call(
        _fused_forward_kernel,
        grid=(G,),
        in_specs=[
            pl.BlockSpec((1, B * HW, K), lambda g: (g, 0, 0)),
            pl.BlockSpec((K, Cmid), lambda g: (0, 0)),
            pl.BlockSpec((1, Cmid), lambda g: (0, 0)),
            pl.BlockSpec((B, B * HW), lambda g: (0, 0)),
            pl.BlockSpec((Cmid, LANE), lambda g: (0, 0)),
            pl.BlockSpec((1, LANE), lambda g: (0, 0)),
        ],
        out_specs=pl.BlockSpec((1, B, LANE), lambda g: (g, 0, 0)),
        out_shape=jax.ShapeDtypeStruct((G, B, LANE), jnp.float32),
        compiler_params=pltpu.CompilerParams(dimension_semantics=("parallel",)),
    )(patches, w2d, b2d, pool, w_eff_pad, b_eff_pad)

    return out.reshape(N, LANE)[:, :num_classes]


# ---------------------------------------------------------------------------
# Parameter init (deterministic, PyTorch-default-style uniform(+-1/sqrt(fan_in)))
# ---------------------------------------------------------------------------
def init_params(key, Cin, Cmid):
    k = jax.random.split(key, 6)

    def uni(rng, shape, fan_in):
        bound = 1.0 / jnp.sqrt(jnp.float32(fan_in))
        return jax.random.uniform(rng, shape, jnp.float32, -bound, bound)

    conv_fan = Cin * 3 * 3
    return {
        "w_conv": uni(k[0], (3, 3, Cin, Cmid), conv_fan),
        "b_conv": uni(k[1], (Cmid,), conv_fan),
        "w1": uni(k[2], (Cmid, 1000), Cmid),        # pretrained.classifier
        "b1": uni(k[3], (1000,), Cmid),
        "w2": uni(k[4], (1000, 2), 1000),           # new_layers = Linear(1000, 2)
        "b2": uni(k[5], (2,), 1000),
    }


# Pure-JAX f32 reference (uncollapsed classifier) used only as a sanity check.
def _reference_forward(x_nchw, params):
    x = jnp.transpose(x_nchw, (0, 2, 3, 1)).astype(jnp.float32)
    y = jax.lax.conv_general_dilated(
        x, params["w_conv"], window_strides=(1, 1), padding="SAME",
        dimension_numbers=("NHWC", "HWIO", "NHWC"))
    y = jnp.maximum(y + params["b_conv"], 0.0)
    feats = jnp.mean(y, axis=(1, 2))
    h = feats @ params["w1"] + params["b1"]
    return h @ params["w2"] + params["b2"]


# TODO(synk): the original `pretrained` backbone is arbitrary/unavailable; it is
# replaced here by a deterministic synthetic conv+GAP+Linear(Cmid,1000) backbone.

if __name__ == "__main__":
    N, Cin, H, W = 2, 4, 16, 16
    Cmid = 32

    key = jax.random.PRNGKey(0)
    kx, kp = jax.random.split(key)
    x = jax.random.normal(kx, (N, Cin, H, W), dtype=jnp.float32)  # NCHW like PyTorch
    params = init_params(kp, Cin, Cmid)

    out = custom_resnet_forward(x, params)
    out = jax.block_until_ready(out)
    assert out.shape == (N, 2) and out.dtype == jnp.float32

    # Numerical check vs. f32 reference; tolerance covers bf16 MXU inputs and
    # the algebraic classifier collapse (pure rounding-level differences).
    ref = _reference_forward(x, params)
    assert jnp.allclose(out, ref, rtol=5e-2, atol=5e-2), "kernel/ref mismatch"

    print("KERNEL_OK")
</pallas_src>

<mosaic_0001>
module attributes {stable_mosaic.version = 11 : i64} {
  func.func @_fused_forward_kernel(%arg0: i32, %arg1: memref<1x256x36xbf16, #tpu.memory_space<vmem>>, %arg2: memref<36x32xbf16, #tpu.memory_space<vmem>>, %arg3: memref<1x32xf32, #tpu.memory_space<vmem>>, %arg4: memref<1x256xf32, #tpu.memory_space<vmem>>, %arg5: memref<32x128xf32, #tpu.memory_space<vmem>>, %arg6: memref<1x128xf32, #tpu.memory_space<vmem>>, %arg7: memref<1x1x128xf32, #tpu.memory_space<vmem>>) attributes {dimension_semantics = [#tpu.dimension_semantics<parallel>], iteration_bounds = array<i64: 2>, scalar_prefetch = 0 : i64, scratch_operands = 0 : i64, tpu.core_type = #tpu.core_type<tc>, window_params = [{transform_indices = @transform_0, window_bounds = array<i64: 1, 256, 36>}, {pipeline_mode = #tpu.pipeline_mode<synchronous>, transform_indices = @transform_1, window_bounds = array<i64: 36, 32>}, {pipeline_mode = #tpu.pipeline_mode<synchronous>, transform_indices = @transform_2, window_bounds = array<i64: 1, 32>}, {pipeline_mode = #tpu.pipeline_mode<synchronous>, transform_indices = @transform_3, window_bounds = array<i64: 1, 256>}, {pipeline_mode = #tpu.pipeline_mode<synchronous>, transform_indices = @transform_4, window_bounds = array<i64: 32, 128>}, {pipeline_mode = #tpu.pipeline_mode<synchronous>, transform_indices = @transform_5, window_bounds = array<i64: 1, 128>}, {transform_indices = @transform_6, window_bounds = array<i64: 1, 1, 128>}]} {
    %c0 = arith.constant 0 : index
    %c0_0 = arith.constant 0 : index
    %c0_1 = arith.constant 0 : index
    %0 = vector.load %arg1[%c0, %c0_0, %c0_1] : memref<1x256x36xbf16, #tpu.memory_space<vmem>>, vector<1x256x36xbf16>
    %1 = vector.shape_cast %0 : vector<1x256x36xbf16> to vector<256x36xbf16>
    %c0_2 = arith.constant 0 : index
    %c0_3 = arith.constant 0 : index
    %2 = vector.load %arg2[%c0_2, %c0_3] : memref<36x32xbf16, #tpu.memory_space<vmem>>, vector<36x32xbf16>
    %cst = arith.constant dense<0.000000e+00> : vector<256x32xf32>
    %3 = tpu.matmul %1, %2, %cst {dimension_numbers = #tpu.dot_dimension_numbers<[1], [0], [0], [1], [0, 0, 1, 1], [], []>} : vector<256x36xbf16>, vector<36x32xbf16>, vector<256x32xf32> -> vector<256x32xf32>
    %c0_4 = arith.constant 0 : index
    %c0_5 = arith.constant 0 : index
    %4 = vector.load %arg3[%c0_4, %c0_5] : memref<1x32xf32, #tpu.memory_space<vmem>>, vector<1x32xf32>
    %5 = vector.broadcast %4 : vector<1x32xf32> to vector<256x32xf32>
    %6 = arith.addf %3, %5 : vector<256x32xf32>
    %cst_6 = arith.constant 0.000000e+00 : f32
    %7 = vector.broadcast %cst_6 : f32 to vector<256x32xf32>
    %8 = arith.maximumf %6, %7 : vector<256x32xf32>
    %c0_7 = arith.constant 0 : index
    %c0_8 = arith.constant 0 : index
    %9 = vector.load %arg4[%c0_7, %c0_8] : memref<1x256xf32, #tpu.memory_space<vmem>>, vector<1x256xf32>
    %cst_9 = arith.constant dense<0.000000e+00> : vector<1x32xf32>
    %10 = tpu.matmul %9, %8, %cst_9 {dimension_numbers = #tpu.dot_dimension_numbers<[1], [0], [0], [1], [0, 0, 1, 1], [], []>} : vector<1x256xf32>, vector<256x32xf32>, vector<1x32xf32> -> vector<1x32xf32>
    %c0_10 = arith.constant 0 : index
    %c0_11 = arith.constant 0 : index
    %11 = vector.load %arg5[%c0_10, %c0_11] : memref<32x128xf32, #tpu.memory_space<vmem>>, vector<32x128xf32>
    %cst_12 = arith.constant dense<0.000000e+00> : vector<1x128xf32>
    %12 = tpu.matmul %10, %11, %cst_12 {dimension_numbers = #tpu.dot_dimension_numbers<[1], [0], [0], [1], [0, 0, 1, 1], [], []>} : vector<1x32xf32>, vector<32x128xf32>, vector<1x128xf32> -> vector<1x128xf32>
    %c0_13 = arith.constant 0 : index
    %c0_14 = arith.constant 0 : index
    %13 = vector.load %arg6[%c0_13, %c0_14] : memref<1x128xf32, #tpu.memory_space<vmem>>, vector<1x128xf32>
    %14 = arith.addf %12, %13 : vector<1x128xf32>
    %c0_15 = arith.constant 0 : index
    %c0_16 = arith.constant 0 : index
    %c0_17 = arith.constant 0 : index
    %15 = vector.load %arg7[%c0_15, %c0_16, %c0_17] : memref<1x1x128xf32, #tpu.memory_space<vmem>>, vector<1x1x128xf32>
    %16 = vector.shape_cast %15 : vector<1x1x128xf32> to vector<1x128xf32>
    %17 = vector.shape_cast %14 : vector<1x128xf32> to vector<1x1x128xf32>
    tpu.vector_store %arg7[%c0_15, %c0_16, %c0_17], %17 {strides = array<i32>} : memref<1x1x128xf32, #tpu.memory_space<vmem>>, vector<1x1x128xf32>,
    return
  }
  func.func @transform_0(%arg0: i32) -> (i32, i32, i32) {
    %c0_i32 = arith.constant 0 : i32
    %c0_i32_0 = arith.constant 0 : i32
    %c0_i32_1 = arith.constant 0 : i32
    return %arg0, %c0_i32, %c0_i32_0 : i32, i32, i32
  }
  func.func @transform_1(%arg0: i32) -> (i32, i32) {
    %c0_i32 = arith.constant 0 : i32
    %c0_i32_0 = arith.constant 0 : i32
    %c0_i32_1 = arith.constant 0 : i32
    return %c0_i32, %c0_i32_0 : i32, i32
  }
  func.func @transform_2(%arg0: i32) -> (i32, i32) {
    %c0_i32 = arith.constant 0 : i32
    %c0_i32_0 = arith.constant 0 : i32
    %c0_i32_1 = arith.constant 0 : i32
    return %c0_i32, %c0_i32_0 : i32, i32
  }
  func.func @transform_3(%arg0: i32) -> (i32, i32) {
    %c0_i32 = arith.constant 0 : i32
    %c0_i32_0 = arith.constant 0 : i32
    %c0_i32_1 = arith.constant 0 : i32
    return %c0_i32, %c0_i32_0 : i32, i32
  }
  func.func @transform_4(%arg0: i32) -> (i32, i32) {
    %c0_i32 = arith.constant 0 : i32
    %c0_i32_0 = arith.constant 0 : i32
    %c0_i32_1 = arith.constant 0 : i32
    return %c0_i32, %c0_i32_0 : i32, i32
  }
  func.func @transform_5(%arg0: i32) -> (i32, i32) {
    %c0_i32 = arith.constant 0 : i32
    %c0_i32_0 = arith.constant 0 : i32
    %c0_i32_1 = arith.constant 0 : i32
    return %c0_i32, %c0_i32_0 : i32, i32
  }
  func.func @transform_6(%arg0: i32) -> (i32, i32, i32) {
    %c0_i32 = arith.constant 0 : i32
    %c0_i32_0 = arith.constant 0 : i32
    %c0_i32_1 = arith.constant 0 : i32
    return %arg0, %c0_i32, %c0_i32_0 : i32, i32, i32
  }
}

</mosaic_0001>

<bundles_post_ra>
// kernel: tpu_custom_call.1
= control target key start
LH: loop header
LB: loop body
LE: loop exit
PB: predicated region body
PF: predicated region fallthrough
CT: control target
= control target key end

     0   :  { %11 = vsyncpa [#allocation3], 0  ;;  %s1448_s0 = inlined_call_operand.vmem [shape: bf16[2,256,36], index: 0, kind: input, shape index: {}]   ;;  %s1449_s1 = inlined_call_operand.vmem [shape: bf16[36,32], index: 1, kind: input, shape index: {}]   ;;  %s1450_s2 = inlined_call_operand.vmem [shape: f32[1,32], index: 2, kind: input, shape index: {}]   ;;  %s1451_s3 = inlined_call_operand.vmem [shape: f32[1,256], index: 3, kind: input, shape index: {}]   ;;  %s1452_s4 = inlined_call_operand.vmem [shape: f32[32,128], index: 4, kind: input, shape index: {}]   ;;  %s1453_s5 = inlined_call_operand.vmem [shape: f32[1,128], index: 5, kind: input, shape index: {}]   ;;  %s1454_s6 = inlined_call_operand.hbm [shape: f32[2,1,128], index: 6, kind: output, shape index: {}]  }
   0x1   :  { %13 = vsyncpa [#allocation3 + $0x1], 0  ;;  %s1223_s21 = smov 0   ;;  %s1225_s22 = smov 0  }
   0x2   :  { %s1227_s23 = smov 0   ;;  %s1229_s24 = smov 0  }
   0x3 LB: > { %s1244_s25 = sadd.s32 4294967295, %s1182_s24   ;;  %s865_s26 = sadd.s32 4294967294, %s1182_s24   ;;  %s1182_s24 = sphi %s1229_s24, %s1460_s24   ;;  %s1178_s23 = sphi %s1227_s23, %s1459_s23   ;;  %s1174_s22 = sphi %s1225_s22, %s1458_s22   ;;  %s1170_s21 = sphi %s1223_s21, %s1457_s21  }
   0x4   : > { %s1248_s27 = sadd.s32 1, %s1182_s24   ;;  %s157_s28 = sadd.s32 1, %s1178_s23 }
   0x5   : > { %s154_s29 = ssub.s32 %s1182_s24, %s1248_s27  ;;  %p167_p0 = scmp.ne.s32.totalorder %s1178_s23, %s1174_s22 }
   0x6   : > { %p155_p1 = scmp.eq.s32.totalorder %s154_s29, 0  ;;  %p168_p2 = scmp.eq.s32.totalorder %s1244_s25, 1 }
   0x7   : > { %p173_p3 = scmp.ne.s32.totalorder %s1174_s22, %s1170_s21  ;;  %p174_p4 = scmp.eq.s32.totalorder %s865_s26, 1 }
   0x8   : > { %s1259_s30 = scalar_select %p155_p1, %s1178_s23, %s157_s28  }
   0x9   : > { %p1261_p5 = por %p168_p2, %p167_p0  ;;  %p1265_p6 = por %p174_p4, %p173_p3 }
   0xa   : > { %p868_p7 = scmp.ge.s32.totalorder %s1182_s24, 1  ;;  %p215_p8 = scmp.lt.s32.totalorder %s1182_s24, 3 }
   0xc   : > { %p216_p9 = pnand %p868_p7, %p215_p8 }
   0xd   : > { %v1101_v0 = vld [vmem:[%s1449_s1] sm:$0xff] (!%p216_p9)   ;;  %v1102_v1 = vld [vmem:[%s1449_s1 + $0x8] sm:$0xff] (!%p216_p9)   ;;  %p244_p10 = scmp.lt.s32.totalorder (!%p216_p9), %s1244_s25, 1  ;;  %v1103_v2 = vld [vmem:[%s1449_s1 + $0x10] ss:$0 sps:$4 sm:$0x33] (!%p216_p9)   ;;  %v637_v20 = vlaneseq (!%p216_p9) }
   0xe   : > { %219 = sbr.rel (%p216_p9) target bundleno = 755 (0x2f3), region = 44  ;;  %971 = vmatprep.subr.bf16.mxu0 (!%p216_p9), %v1101_v0  ;;  %vm438_vm0 = vcmask (!%p216_p9), 1041408   ;;  %vm389_vm1 = vcmask (!%p216_p9), 293888   ;;  %v635_v23 = vld [vmem:[%s1451_s3] sm:$0x3] (!%p216_p9)  ;;  %vm1185_vm2 = vmmov (!%p216_p9), 0  }
   0xf   : > { %972 = vmatpush3.bf16.msra.mxu0 (!%p216_p9), %v1101_v0  ;;  %v440_v4 = vsel (!%p216_p9), %vm438_vm0, %v1103_v2, 0  ;;  %v638_v21 = vshrl.u32 (!%p216_p9), %v637_v20, 7  ;;  %v1327_v27 = vld [vmem:[%s1450_s2] ss:$0 sm:$0xff] (!%p216_p9)  ;;  %vm722_vm3 = vcmask (!%p216_p9), 261120   ;;  %s242_s17 = sand.u32 (!%p216_p9), 1, %s1174_s22  }
  0x10   : > { %973 = vmatprep.subr.bf16.mxu0 (!%p216_p9), %v1102_v1  ;;  %s908_s20 = sshll.u32 (!%p216_p9), %s1244_s25, 4  ;;  %s243_s26 = scalar_lea.vmem (!%p216_p9), [#allocation2], %s242_s17 }
  0x11   : > { %v643_v22 = vsub.s32 (!%p216_p9), 1, %v638_v21  ;;  %v639_v24 = vsub.s32 (!%p216_p9), 0, %v638_v21  ;;  %s810_s28 = sshll.u32 (!%p216_p9), %s243_s26, 4  ;;  %s1406_s10 = scalar_lea.hbm (!%p216_p9), %s1454_s6, %s908_s20  ;;  %s1408_s28 = int_to_ptr.vmem [resolvable:$true] %s810_s28 }
  0x12   : > { %s798_s11 = scalar_lea.sflag (!%p216_p9), [#allocation3], %s242_s17  ;;  %s1120_s12 = scalar_lea.vmem (!%p216_p9), %s1408_s28, 16 }
  0x13   : > { %974 = vmatpush3.bf16.msra.mxu0 (!%p216_p9), %v1102_v1  ;;  %v644_v25 = vrot.slane (!%p216_p9), %v635_v23, %v643_v22  ;;  %v1322_v26 = vrot.slane (!%p216_p9), %v635_v23, %v639_v24  ;;  %p1121_p11 = scmp.ne.s32.totalorder (!%p216_p9), %s1408_s28, %s1120_s12 }
  0x14   : > { %1058 = vmatprep.subr.msk.bf16.mxu0 (!%p216_p9), %vm438_vm0, %v1103_v2 }
  0x15   : > { %s245_s13 = scalar_select %p244_p10, %s1244_s25, 1  ;;  %711 = vmatprep.mubr.f32.mxu1 %v644_v25 }
  0x16   : > { %p1122_p12 = pnand %p1121_p11, %p1261_p5  ;;  %s1187_s25 = smov [#allocation2]  }
  0x17   : > { %s911_s16 = sshll.u32 %s245_s13, 7  ;;  %976 = vmatpush3.bf16.msra.mxu0 %v440_v4  ;;  %s1124_s13 = sshll.u32 %s1187_s25, 4  ;;  %s1125_s13 = int_to_ptr.vmem [resolvable:$false] %s1124_s13 }
  0x18   : > { %s1285_s19 = scalar_lea.vmem %s1448_s0, %s911_s16  ;;  %p1123_p13 = pneg %p1122_p12 }
  0x19   : > { %v1104_v3 = vld [vmem:[%s1285_s19] sm:$0xff]   ;;  %v1105_v5 = vld [vmem:[%s1285_s19 + $0x8] sm:$0xff]   ;;  %v1106_v6 = vld [vmem:[%s1285_s19 + $0x10] sm:$0xff]   ;;  %s1126_s14 = scalar_lea.vmem %s1125_s13, 32  ;;  %p1127_p0 = scmp.lt.s32.totalorder %s1408_s28, %s1125_s13 }
  0x1a   : > { %977 = vmatprep.mubr.msk.bf16.mxu0 %vm389_vm1, %v1104_v3  ;;  %v1107_v7 = vld [vmem:[%s1285_s19 + $0x18] sm:$0xff]   ;;  %v1108_v8 = vld [vmem:[%s1285_s19 + $0x20] sm:$0xff]   ;;  %v1109_v9 = vld [vmem:[%s1285_s19 + $0x28] sm:$0xff]   ;;  %p1128_p1 = scmp.lt.s32.totalorder %s1126_s14, %s1120_s12 }
  0x1b   : > { %978 = vmatmul.mubr.msk.bf16.vlgmr.msra.gmra.mrb[0].mxu0 %vm389_vm1, %v1105_v5  ;;  %v1110_v10 = vld [vmem:[%s1285_s19 + $0x30] sm:$0xff]   ;;  %v1111_v11 = vld [vmem:[%s1285_s19 + $0x38] sm:$0xff]   ;;  %v1112_v12 = vld [vmem:[%s1285_s19 + $0x40] sm:$0xff]  }
  0x1c   : > { %981 = vmatprep.mubr.msk.bf16.mxu0 %vm389_vm1, %v1106_v6  ;;  %v1113_v13 = vld [vmem:[%s1285_s19 + $0x48] sm:$0xff]   ;;  %v1114_v14 = vld [vmem:[%s1285_s19 + $0x50] sm:$0xff]   ;;  %v1115_v15 = vld [vmem:[%s1285_s19 + $0x58] sm:$0xff]   ;;  %p1129_p2 = por %p1128_p1, %p1127_p0 }
  0x1d   : > { %v1116_v16 = vld [vmem:[%s1285_s19 + $0x60] sm:$0xff]   ;;  %v1117_v17 = vld [vmem:[%s1285_s19 + $0x68] sm:$0xff]   ;;  %v1118_v18 = vld [vmem:[%s1285_s19 + $0x70] sm:$0xff]  }
  0x1e   : > { %v1119_v19 = vld [vmem:[%s1285_s19 + $0x78] sm:$0xff]   ;;  %p1130_p3 = pnand %p1129_p2, %p1123_p13 }
  0x23   : > { %982 = vmatmul.mubr.msk.bf16.gmra.mrb[4].mxu0 %vm389_vm1, %v1107_v7 }
  0x24   : > { %985 = vmatprep.mubr.msk.bf16.mxu0 %vm389_vm1, %v1108_v8 }
  0x2b   : > { %986 = vmatmul.mubr.msk.bf16.gmra.mrb[8].mxu0 %vm389_vm1, %v1109_v9 }
  0x2c   : > { %989 = vmatprep.mubr.msk.bf16.mxu0 %vm389_vm1, %v1110_v10 }
  0x33   : > { %990 = vmatmul.mubr.msk.bf16.gmra.mrb[12].mxu0 %vm389_vm1, %v1111_v11 }
  0x34   : > { %993 = vmatprep.mubr.msk.bf16.mxu0 %vm389_vm1, %v1112_v12 }
  0x3b   : > { %994 = vmatmul.mubr.msk.bf16.gmra.mrb[16].mxu0 %vm389_vm1, %v1113_v13 }
  0x3c   : > { %997 = vmatprep.mubr.msk.bf16.mxu0 %vm389_vm1, %v1114_v14 }
  0x43   : > { %998 = vmatmul.mubr.msk.bf16.gmra.mrb[20].mxu0 %vm389_vm1, %v1115_v15 }
  0x44   : > { %1001 = vmatprep.mubr.msk.bf16.mxu0 %vm389_vm1, %v1116_v16 }
  0x4b   : > { %1002 = vmatmul.mubr.msk.bf16.gmra.mrb[24].mxu0 %vm389_vm1, %v1117_v17 }
  0x4c   : > { %1005 = vmatprep.mubr.msk.bf16.mxu0 %vm389_vm1, %v1118_v18 }
  0x53   : > { %1006 = vmatmul.mubr.msk.bf16.gmra.mrb[28].mxu0 %vm389_vm1, %v1119_v19 }
  0xee   : > { %v979_v28 = vpop.f32.mrb[0].mxu0 }
  0xef   : > { %v485_v29 = vadd.f32 %v979_v28, %v1327_v27  ;;  %v476_v30 = vpop.f32.mrb[1].mxu0 }
  0xf0   : > { %v477_v31 = vadd.f32 %v1327_v27, %v476_v30  ;;  %v980_v32 = vpop.f32.mrb[2].mxu0 }
  0xf1   : > { %v488_v33 = vadd.f32 %v980_v32, %v1327_v27  ;;  %v479_v34 = vpop.f32.mrb[3].mxu0  ;;  %v605_v36 = vmax.f32 %v485_v29, 0.0 }
  0xf2   : > { %v480_v35 = vadd.f32 %v1327_v27, %v479_v34  ;;  %v603_v38 = vmax.f32 %v477_v31, 0.0 }
  0xf3   : > { %v606_v37 = vmax.f32 %v488_v33, 0.0 }
  0xf4   : > { %v604_v39 = vmax.f32 %v480_v35, 0.0 }
  0xf5   : > { %v1333_v40 = vpack.c.bf16 %v606_v37, %v605_v36 }
  0xf6   : > { %v983_v41 = vpop.f32.mrb[4].mxu0  ;;  %v1335_v42 = vpack.c.bf16 %v604_v39, %v603_v38 }
  0xf7   : > { %v501_v43 = vadd.f32 %v983_v41, %v1327_v27  ;;  %v492_v44 = vpop.f32.mrb[5].mxu0 }
  0xf8   : > { %v493_v45 = vadd.f32 %v1327_v27, %v492_v44  ;;  %v984_v46 = vpop.f32.mrb[6].mxu0 }
  0xf9   : > { %v504_v47 = vadd.f32 %v984_v46, %v1327_v27  ;;  %v495_v48 = vpop.f32.mrb[7].mxu0  ;;  %v609_v50 = vmax.f32 %v501_v43, 0.0 }
  0xfa   : > { %v496_v49 = vadd.f32 %v1327_v27, %v495_v48  ;;  %v607_v52 = vmax.f32 %v493_v45, 0.0 }
  0xfb   : > { %v610_v51 = vmax.f32 %v504_v47, 0.0 }
  0xfc   : > { %v608_v53 = vmax.f32 %v496_v49, 0.0 }
  0xfd   : > { %v1341_v54 = vpack.c.bf16 %v610_v51, %v609_v50 }
  0xfe   : > { %v1343_v55 = vpack.c.bf16 %v608_v53, %v607_v52  ;;  %v987_v56 = vpop.f32.mrb[8].mxu0 }
  0xff   : > { %v517_v57 = vadd.f32 %v987_v56, %v1327_v27  ;;  %v508_v58 = vpop.f32.mrb[9].mxu0 }
 0x100   : > { %v509_v59 = vadd.f32 %v1327_v27, %v508_v58  ;;  %v988_v60 = vpop.f32.mrb[10].mxu0 }
 0x101   : > { %v520_v61 = vadd.f32 %v988_v60, %v1327_v27  ;;  %v511_v62 = vpop.f32.mrb[11].mxu0  ;;  %v613_v0 = vmax.f32 %v517_v57, 0.0 }
 0x102   : > { %v512_v63 = vadd.f32 %v1327_v27, %v511_v62  ;;  %v611_v2 = vmax.f32 %v509_v59, 0.0 }
 0x103   : > { %v614_v1 = vmax.f32 %v520_v61, 0.0 }
 0x104   : > { %v612_v3 = vmax.f32 %v512_v63, 0.0 }
 0x105   : > { %v1349_v4 = vpack.c.bf16 %v614_v1, %v613_v0 }
 0x106   : > { %v1351_v5 = vpack.c.bf16 %v612_v3, %v611_v2  ;;  %v991_v6 = vpop.f32.mrb[12].mxu0 }
 0x107   : > { %v533_v7 = vadd.f32 %v991_v6, %v1327_v27  ;;  %v524_v8 = vpop.f32.mrb[13].mxu0 }
 0x108   : > { %v525_v9 = vadd.f32 %v1327_v27, %v524_v8  ;;  %v992_v10 = vpop.f32.mrb[14].mxu0 }
 0x109   : > { %v536_v11 = vadd.f32 %v992_v10, %v1327_v27  ;;  %v527_v12 = vpop.f32.mrb[15].mxu0  ;;  %v617_v14 = vmax.f32 %v533_v7, 0.0 }
 0x10a   : > { %v528_v13 = vadd.f32 %v1327_v27, %v527_v12  ;;  %v615_v16 = vmax.f32 %v525_v9, 0.0 }
 0x10b   : > { %v618_v15 = vmax.f32 %v536_v11, 0.0 }
 0x10c   : > { %v616_v17 = vmax.f32 %v528_v13, 0.0 }
 0x10d   : > { %v1357_v18 = vpack.c.bf16 %v618_v15, %v617_v14 }
 0x10e   : > { %v1359_v19 = vpack.c.bf16 %v616_v17, %v615_v16  ;;  %v995_v20 = vpop.f32.mrb[16].mxu0  ;;  %v717_v16 = vld [vmem:[%s1452_s4] sm:$0xff]  ;;  %v1184_v17 = vmov 0.0|0.0  }
 0x10f   : > { %v549_v21 = vadd.f32 %v995_v20, %v1327_v27  ;;  %v540_v22 = vpop.f32.mrb[17].mxu0 }
 0x110   : > { %v541_v23 = vadd.f32 %v1327_v27, %v540_v22  ;;  %v996_v24 = vpop.f32.mrb[18].mxu0 }
 0x111   : > { %v552_v25 = vadd.f32 %v996_v24, %v1327_v27  ;;  %v543_v28 = vpop.f32.mrb[19].mxu0  ;;  %v621_v30 = vmax.f32 %v549_v21, 0.0 }
 0x112   : > { %v544_v29 = vadd.f32 %v1327_v27, %v543_v28  ;;  %v619_v32 = vmax.f32 %v541_v23, 0.0  ;;  %v721_v23 = vld [vmem:[%s1453_s5] sm:$0x1] }
 0x113   : > { %v622_v31 = vmax.f32 %v552_v25, 0.0 }
 0x114   : > { %v620_v33 = vmax.f32 %v544_v29, 0.0 }
 0x115   : > { %v1024_v34 = vpack.c.bf16 %v622_v31, %v621_v30 }
 0x116   : > { %v999_v35 = vpop.f32.mrb[20].mxu0  ;;  %v1020_v36 = vpack.c.bf16 %v620_v33, %v619_v32 }
 0x117   : > { %v565_v37 = vadd.f32 %v999_v35, %v1327_v27  ;;  %v556_v38 = vpop.f32.mrb[21].mxu0 }
 0x118   : > { %v557_v39 = vadd.f32 %v1327_v27, %v556_v38  ;;  %v1000_v41 = vpop.f32.mrb[22].mxu0  ;;  %1021 = vmatprep.subr.bf16.mxu1 %v1020_v36 }
 0x119   : > { %v568_v43 = vadd.f32 %v1000_v41, %v1327_v27  ;;  %v559_v44 = vpop.f32.mrb[23].mxu0  ;;  %1023 = vmatpush3.bf16.msra.mxu1 %v1335_v42  ;;  %v625_v46 = vmax.f32 %v565_v37, 0.0 }
 0x11a   : > { %v560_v45 = vadd.f32 %v1327_v27, %v559_v44  ;;  %1025 = vmatprep.subr.bf16.mxu1 %v1024_v34  ;;  %v623_v48 = vmax.f32 %v557_v39, 0.0 }
 0x11b   : > { %v626_v47 = vmax.f32 %v568_v43, 0.0 }
 0x11c   : > { %v624_v49 = vmax.f32 %v560_v45, 0.0 }
 0x11d   : > { %v1032_v50 = vpack.c.bf16 %v626_v47, %v625_v46  ;;  %1027 = vmatpush3.bf16.msra.mxu1 %v1333_v40 }
 0x11e   : > { %v1028_v51 = vpack.c.bf16 %v624_v49, %v623_v48  ;;  %v1003_v52 = vpop.f32.mrb[24].mxu0 }
 0x11f   : > { %v581_v53 = vadd.f32 %v1003_v52, %v1327_v27  ;;  %v572_v56 = vpop.f32.mrb[25].mxu0 }
 0x120   : > { %v573_v57 = vadd.f32 %v1327_v27, %v572_v56  ;;  %v1004_v58 = vpop.f32.mrb[26].mxu0  ;;  %1029 = vmatprep.subr.bf16.mxu1 %v1028_v51 }
 0x121   : > { %v584_v42 = vadd.f32 %v1004_v58, %v1327_v27  ;;  %v575_v59 = vpop.f32.mrb[27].mxu0  ;;  %1031 = vmatpush3.bf16.msra.mxu1 %v1343_v55  ;;  %v629_v61 = vmax.f32 %v581_v53, 0.0 }
 0x122   : > { %v576_v60 = vadd.f32 %v1327_v27, %v575_v59  ;;  %1033 = vmatprep.subr.bf16.mxu1 %v1032_v50  ;;  %v627_v40 = vmax.f32 %v573_v57, 0.0 }
 0x123   : > { %v630_v62 = vmax.f32 %v584_v42, 0.0 }
 0x124   : > { %v628_v63 = vmax.f32 %v576_v60, 0.0 }
 0x125   : > { %v1040_v0 = vpack.c.bf16 %v630_v62, %v629_v61  ;;  %1035 = vmatpush3.bf16.msra.mxu1 %v1341_v54 }
 0x126   : > { %v1036_v1 = vpack.c.bf16 %v628_v63, %v627_v40  ;;  %v1007_v2 = vpop.f32.mrb[28].mxu0 }
 0x127   : > { %v597_v3 = vadd.f32 %v1007_v2, %v1327_v27  ;;  %v588_v6 = vpop.f32.mrb[29].mxu0 }
 0x128   : > { %v589_v7 = vadd.f32 %v1327_v27, %v588_v6  ;;  %v1008_v8 = vpop.f32.mrb[30].mxu0  ;;  %1037 = vmatprep.subr.bf16.mxu1 %v1036_v1 }
 0x129   : > { %v600_v55 = vadd.f32 %v1008_v8, %v1327_v27  ;;  %v591_v9 = vpop.f32.mrb[31].mxu0  ;;  %1039 = vmatpush3.bf16.msra.mxu1 %v1351_v5  ;;  %v633_v11 = vmax.f32 %v597_v3, 0.0 }
 0x12a   : > { %v592_v10 = vadd.f32 %v1327_v27, %v591_v9  ;;  %1041 = vmatprep.subr.bf16.mxu1 %v1040_v0  ;;  %v631_v54 = vmax.f32 %v589_v7, 0.0  ;;  %v718_v27 = vld [vmem:[%s1452_s4 + $0x8] sm:$0xff] }
 0x12b   : > { %v634_v12 = vmax.f32 %v600_v55, 0.0  ;;  %v1053_v5 = vpack.c.bf16 %v718_v27, %v717_v16 }
 0x12c   : > { %v632_v13 = vmax.f32 %v592_v10, 0.0 }
 0x12d   : > { %v1048_v14 = vpack.c.bf16 %v634_v12, %v633_v11  ;;  %1043 = vmatpush3.bf16.msra.mxu1 %v1349_v4  ;;  %v719_v4 = vld [vmem:[%s1452_s4 + $0x10] sm:$0xff] }
 0x12e   : > { %v1044_v15 = vpack.c.bf16 %v632_v13, %v631_v54 }
 0x130   : > { %1045 = vmatprep.subr.bf16.mxu1 %v1044_v15 }
 0x131   : > { %1047 = vmatpush3.bf16.msra.mxu1 %v1359_v19  ;;  %v720_v19 = vld [vmem:[%s1452_s4 + $0x18] sm:$0xff] }
 0x132   : > { %1049 = vmatprep.subr.bf16.mxu1 %v1048_v14  ;;  %v1056_v20 = vpack.c.bf16 %v720_v19, %v719_v4 }
 0x135   : > { %1051 = vmatpush3.bf16.msra.mxu1 %v1357_v18  ;;  %v1186_v18 = vmov 0.0  }
 0x136   : > { %1052 = vmatprep.subr.bf16.mxu1 %v1184_v17 }
 0x138   : > { %712 = vmatmul.mubr.f32.vlgmr.msra.gmra.mrb[0].mxu1 %v1322_v26 }
 0x139   : > { %1054 = vmatpush3.bf16.msra.mxu1 %v1053_v5  ;;  %1017 = vmatprep.mubr.msk.f32.mxu1 %vm1185_vm2, %v1186_v18 }
 0x13a   : > { %1055 = vmatprep.subr.bf16.mxu1 %v1184_v17 }
 0x13d   : > { %1057 = vmatpush3.bf16.msra.mxu1 %v1056_v20 }
 0x20b   : > { %v963_v21 = vpop.f32.mrb[0].mxu1 }
 0x20c   : > { %v964_v22 = vpop.f32.mrb[1].mxu1 }
 0x20d   : > { %v965_v26 = vadd.f32 %v964_v22, %v963_v21 }
 0x20f   : > { %1018 = vmatmul.mubr.msk.f32.vlgmr.msra.gmra.mrb[2].mxu1 %vm722_vm3, %v965_v26 }
 0x2e2   : > { %v792_v24 = vpop.f32.mrb[2].mxu1 }
 0x2e3   : > { %v793_v25 = vadd.f32 %v792_v24, %v721_v23  ;;  %v1019_v28 = vpop.f32.mrb[3].mxu1 }
 0x2e5   : > { %796 = vst [vmem:[%s243_s26] sm:$0x1] %v793_v25 }
 0x2e6   : > { %1133 = shalt.err (!%p1130_p3)
}
 0x2e7   : > { %s1134_s15 = scalar_lea.hbm %s1406_s10, 16  ;;  %s1138_s18 = scalar_lea.hbm %s1454_s6, 32 }
 0x2e8   : > { %p1135_p4 = scmp.ne.s32.totalorder %s1406_s10, %s1134_s15  ;;  %p1139_p9 = scmp.lt.u32.totalorder %s1406_s10, %s1454_s6 }
 0x2e9   : > { %p1140_p10 = scmp.lt.u32.totalorder %s1138_s18, %s1134_s15  ;;  %p1142_p12 = scmp.lt.u32.totalorder %s1134_s15, %s1406_s10 }
 0x2ea   : > { %p1136_p7 = pnand %p1135_p4, %p1261_p5 }
 0x2eb   : > { %p1141_p11 = por %p1140_p10, %p1139_p9 }
 0x2ec   : > { %p1137_p8 = pneg %p1136_p7 }
 0x2ed   : > { %p1143_p13 = por %p1142_p12, %p1141_p11 }
 0x2ef   : > { %p1144_p0 = pnand %p1143_p13, %p1137_p8 }
 0x2f1   : > { %1147 = shalt.err (!%p1144_p0)
}
 0x2f2   : > { %1059 = dma.vmem_to_hbm [thread:$0]  (%p1261_p5), %s1408_s28, 16, %s1406_s10, %s798_s11  }
 0x2f3 PF: > { %p1065_p1 = scmp.ge.s32.totalorder %s1182_s24, 2  ;;  %s822_s26 = sand.u32 1, %s1170_s21  }
 0x2f4   : > { %s823_s29 = scalar_lea.sflag [#allocation3], %s822_s26 }
 0x2f5   : > { %p1062_p2 = pnand %p1065_p1, %p1265_p6 }
 0x2f7   : > { %1165 = dma.done.wait (!%p1062_p2), %s823_s29, 16  }
 0x2f8   : > { %1167 = vsyncadd (!%p1062_p2), %s823_s29, 4294967280  ;;  %p16_p3 = scmp.ge.s32.totalorder %s1248_s27, 4   ;;  %s1457_s21 = smov %s1174_s22 }
 0x2f9   : > { %s1458_s22 = smov %s1178_s23  ;;  %s1459_s23 = smov %s1259_s30 }
 0x2fa   : > { %s1460_s24 = smov %s1248_s27  ;;  %18 = sbr.rel (!%p16_p3) target bundleno = 3 (0x3), region = 79 }
 0x301   :  { %827 = vsyncpa [#allocation3], 1 }
 0x302   :  { %829 = vsyncpa [#allocation3 + $0x1], 1 }

</bundles_post_ra>
